<compile_context>
chip_gen: v7x
topology: tpu7x:2x2x1
jax: 0.10.0
libtpu: 0.0.40
codegen_flags: <defaults>
</compile_context>

<pallas_src>
import jax
import jax.numpy as jnp
from jax.experimental import pallas as pl
from jax.experimental.pallas import tpu as pltpu


def qvalue_kernel(x_ref, a_ref, w1x_ref, w1a_ref, b1_ref, w2_ref, b2_ref, out_ref):
    # fc1 with the concat fused away:  cat @ W1.T == x @ W1x + a @ W1a
    h = jnp.dot(x_ref[...], w1x_ref[...], preferred_element_type=jnp.float32)
    h = h + jnp.dot(a_ref[...], w1a_ref[...], preferred_element_type=jnp.float32)
    h = jnp.maximum(h + b1_ref[...], 0.0)
    # fc2 (output width 1): VPU multiply + XLU lane reduce — avoids an N=1 MXU
    # pass and the need to transpose w2.
    q = jnp.sum(h * w2_ref[...], axis=-1, keepdims=True)     # (TB, 1)
    out_ref[...] = q + b2_ref[0, 0]                           # scalar bias from SMEM


def qvalue_forward(x, a, params, *, block_batch=512):
    """Q(s, a) forward. x: (B, state_dim), a: (B, action_dim).

    params: (w1x, w1a, b1, w2, b2) in kernel layout (see params_from_torch_layout).
    """
    w1x, w1a, b1, w2, b2 = params
    state_dim, hidden_dim = w1x.shape
    action_dim = w1a.shape[0]
    B = x.shape[0]

    if B <= block_batch:
        # Single block: block dims equal the full array dims, so the (8,128)
        # divisibility rule is satisfied by the full-dim exemption.
        TB, Bp = B, B
        xp, ap = x, a
    else:
        TB = block_batch                      # multiple of 8
        Bp = pl.cdiv(B, TB) * TB
        if Bp != B:                           # pad ragged tail (rows sliced off below)
            xp = jnp.pad(x, ((0, Bp - B), (0, 0)))
            ap = jnp.pad(a, ((0, Bp - B), (0, 0)))
        else:
            xp, ap = x, a
    num_tiles = Bp // TB

    # Weights / biases stay resident across the batch grid (block index is
    # constant, so Pallas does not re-DMA them per tile).
    resident = lambda shape: pl.BlockSpec(shape, lambda i: (0, 0))

    out = pl.pallas_call(
        qvalue_kernel,
        out_shape=jax.ShapeDtypeStruct((Bp, 1), jnp.float32),
        grid=(num_tiles,),
        in_specs=[
            pl.BlockSpec((TB, state_dim), lambda i: (i, 0)),     # x tile
            pl.BlockSpec((TB, action_dim), lambda i: (i, 0)),    # a tile
            resident((state_dim, hidden_dim)),                   # w1x
            resident((action_dim, hidden_dim)),                  # w1a
            resident((1, hidden_dim)),                           # b1
            resident((1, hidden_dim)),                           # w2
            pl.BlockSpec(memory_space=pltpu.MemorySpace.SMEM),   # b2 scalar
        ],
        out_specs=pl.BlockSpec((TB, 1), lambda i: (i, 0)),
        compiler_params=pltpu.CompilerParams(
            dimension_semantics=("parallel",),                   # shard batch tiles
        ),
    )(xp, ap, w1x, w1a, b1, w2, b2)
    return out[:B] if Bp != B else out


def params_from_torch_layout(w1, b1, w2, b2, state_dim):
    """One-time conversion from PyTorch nn.Linear layout to kernel layout.

    w1: (hidden, state_dim+action_dim), b1: (hidden,),
    w2: (1, hidden),                    b2: (1,).
    Done once at init so the per-call forward needs no XLA transpose/concat.
    """
    w1x = jnp.asarray(w1[:, :state_dim].T)            # (state_dim, hidden)
    w1a = jnp.asarray(w1[:, state_dim:].T)            # (action_dim, hidden)
    return (w1x, w1a,
            jnp.asarray(b1).reshape(1, -1),           # (1, hidden)
            jnp.asarray(w2).reshape(1, -1),           # (1, hidden)
            jnp.asarray(b2).reshape(1, 1))            # (1, 1)


def init_torch_params(key, state_dim, hidden_dim, action_dim):
    """torch.nn.Linear-style init (uniform +-1/sqrt(fan_in)) in PyTorch layout."""
    in_dim = state_dim + action_dim
    k1, k2, k3, k4 = jax.random.split(key, 4)
    bound1 = 1.0 / jnp.sqrt(in_dim)
    bound2 = 1.0 / jnp.sqrt(hidden_dim)
    w1 = jax.random.uniform(k1, (hidden_dim, in_dim), jnp.float32, -bound1, bound1)
    b1 = jax.random.uniform(k2, (hidden_dim,), jnp.float32, -bound1, bound1)
    w2 = jax.random.uniform(k3, (1, hidden_dim), jnp.float32, -bound2, bound2)
    b2 = jax.random.uniform(k4, (1,), jnp.float32, -bound2, bound2)
    return w1, b1, w2, b2


def reference_forward(x, a, w1, b1, w2, b2):
    """Plain-JAX reference with the exact PyTorch forward semantics."""
    cat = jnp.concatenate([x, a], axis=1)
    h = jnp.maximum(cat @ w1.T + b1, 0.0)
    return h @ w2.T + b2


if __name__ == "__main__":
    # Pendulum-v1 critic sizes: state_dim=3, action_dim=1, hidden_dim=128.
    state_dim, action_dim, hidden_dim = 3, 1, 128

    key = jax.random.PRNGKey(0)
    kx, ka, kp = jax.random.split(key, 3)
    w1, b1, w2, b2 = init_torch_params(kp, state_dim, hidden_dim, action_dim)
    params = params_from_torch_layout(w1, b1, w2, b2, state_dim)

    # 1) Small single-block case (grid=(1,)).
    B_small = 8
    x = jax.random.normal(kx, (B_small, state_dim), jnp.float32)
    a = jax.random.normal(ka, (B_small, action_dim), jnp.float32)
    out = qvalue_forward(x, a, params)
    jax.block_until_ready(out)
    ref = reference_forward(x, a, w1, b1, w2, b2)
    assert out.shape == (B_small, 1)
    assert jnp.allclose(out, ref, atol=1e-4, rtol=1e-4)

    # 2) Batched case exercising the parallel grid + ragged-tail padding.
    B_big = 700
    kx2, ka2 = jax.random.split(kx)
    xb = jax.random.normal(kx2, (B_big, state_dim), jnp.float32)
    ab = jax.random.normal(ka2, (B_big, action_dim), jnp.float32)
    outb = qvalue_forward(xb, ab, params, block_batch=256)   # grid=(3,), padded to 768
    jax.block_until_ready(outb)
    refb = reference_forward(xb, ab, w1, b1, w2, b2)
    assert outb.shape == (B_big, 1)
    assert jnp.allclose(outb, refb, atol=1e-4, rtol=1e-4)

    print("KERNEL_OK")
</pallas_src>

<mosaic_0001>
module attributes {stable_mosaic.version = 11 : i64} {
  func.func @qvalue_kernel(%arg0: i32, %arg1: memref<8x3xf32, #tpu.memory_space<vmem>>, %arg2: memref<8x1xf32, #tpu.memory_space<vmem>>, %arg3: memref<3x128xf32, #tpu.memory_space<vmem>>, %arg4: memref<1x128xf32, #tpu.memory_space<vmem>>, %arg5: memref<1x128xf32, #tpu.memory_space<vmem>>, %arg6: memref<1x128xf32, #tpu.memory_space<vmem>>, %arg7: memref<1x1xf32, #tpu.memory_space<smem>>, %arg8: memref<8x1xf32, #tpu.memory_space<vmem>>) attributes {dimension_semantics = [#tpu.dimension_semantics<parallel>], iteration_bounds = array<i64: 1>, scalar_prefetch = 0 : i64, scratch_operands = 0 : i64, tpu.core_type = #tpu.core_type<tc>, window_params = [{transform_indices = @transform_0, window_bounds = array<i64: 8, 3>}, {transform_indices = @transform_1, window_bounds = array<i64: 8, 1>}, {pipeline_mode = #tpu.pipeline_mode<synchronous>, transform_indices = @transform_2, window_bounds = array<i64: 3, 128>}, {pipeline_mode = #tpu.pipeline_mode<synchronous>, transform_indices = @transform_3, window_bounds = array<i64: 1, 128>}, {pipeline_mode = #tpu.pipeline_mode<synchronous>, transform_indices = @transform_4, window_bounds = array<i64: 1, 128>}, {pipeline_mode = #tpu.pipeline_mode<synchronous>, transform_indices = @transform_5, window_bounds = array<i64: 1, 128>}, {transform_indices = @transform_6, window_bounds = array<i64: 1, 1>}, {transform_indices = @transform_7, window_bounds = array<i64: 8, 1>}]} {
    %c0 = arith.constant 0 : index
    %c0_0 = arith.constant 0 : index
    %0 = vector.load %arg1[%c0, %c0_0] : memref<8x3xf32, #tpu.memory_space<vmem>>, vector<8x3xf32>
    %c0_1 = arith.constant 0 : index
    %c0_2 = arith.constant 0 : index
    %1 = vector.load %arg3[%c0_1, %c0_2] : memref<3x128xf32, #tpu.memory_space<vmem>>, vector<3x128xf32>
    %cst = arith.constant dense<0.000000e+00> : vector<8x128xf32>
    %2 = tpu.matmul %0, %1, %cst {dimension_numbers = #tpu.dot_dimension_numbers<[1], [0], [0], [1], [0, 0, 1, 1], [], []>} : vector<8x3xf32>, vector<3x128xf32>, vector<8x128xf32> -> vector<8x128xf32>
    %c0_3 = arith.constant 0 : index
    %c0_4 = arith.constant 0 : index
    %3 = vector.load %arg2[%c0_3, %c0_4] : memref<8x1xf32, #tpu.memory_space<vmem>>, vector<8x1xf32>
    %c0_5 = arith.constant 0 : index
    %c0_6 = arith.constant 0 : index
    %4 = vector.load %arg4[%c0_5, %c0_6] : memref<1x128xf32, #tpu.memory_space<vmem>>, vector<1x128xf32>
    %cst_7 = arith.constant dense<0.000000e+00> : vector<8x128xf32>
    %5 = tpu.matmul %3, %4, %cst_7 {dimension_numbers = #tpu.dot_dimension_numbers<[1], [0], [0], [1], [0, 0, 1, 1], [], []>} : vector<8x1xf32>, vector<1x128xf32>, vector<8x128xf32> -> vector<8x128xf32>
    %6 = arith.addf %2, %5 : vector<8x128xf32>
    %c0_8 = arith.constant 0 : index
    %c0_9 = arith.constant 0 : index
    %7 = vector.load %arg5[%c0_8, %c0_9] : memref<1x128xf32, #tpu.memory_space<vmem>>, vector<1x128xf32>
    %8 = vector.broadcast %7 : vector<1x128xf32> to vector<8x128xf32>
    %9 = arith.addf %6, %8 : vector<8x128xf32>
    %cst_10 = arith.constant 0.000000e+00 : f32
    %10 = vector.broadcast %cst_10 : f32 to vector<8x128xf32>
    %11 = arith.maximumf %9, %10 : vector<8x128xf32>
    %c0_11 = arith.constant 0 : index
    %c0_12 = arith.constant 0 : index
    %12 = vector.load %arg6[%c0_11, %c0_12] : memref<1x128xf32, #tpu.memory_space<vmem>>, vector<1x128xf32>
    %13 = vector.broadcast %12 : vector<1x128xf32> to vector<8x128xf32>
    %14 = arith.mulf %11, %13 : vector<8x128xf32>
    %cst_13 = arith.constant dense<0.000000e+00> : vector<8xf32>
    %15 = vector.multi_reduction <add>, %14, %cst_13 [1] : vector<8x128xf32> to vector<8xf32>
    %16 = vector.shape_cast %15 : vector<8xf32> to vector<8x1xf32>
    %c0_14 = arith.constant 0 : index
    %c0_15 = arith.constant 0 : index
    %17 = memref.load %arg7[%c0_14, %c0_15] : memref<1x1xf32, #tpu.memory_space<smem>>
    %18 = vector.broadcast %17 : f32 to vector<8x1xf32>
    %19 = arith.addf %16, %18 : vector<8x1xf32>
    %c0_16 = arith.constant 0 : index
    %c0_17 = arith.constant 0 : index
    %20 = vector.load %arg8[%c0_16, %c0_17] : memref<8x1xf32, #tpu.memory_space<vmem>>, vector<8x1xf32>
    tpu.vector_store %arg8[%c0_16, %c0_17], %19 {strides = array<i32>} : memref<8x1xf32, #tpu.memory_space<vmem>>, vector<8x1xf32>,
    return
  }
  func.func @transform_0(%arg0: i32) -> (i32, i32) {
    %c0_i32 = arith.constant 0 : i32
    %c0_i32_0 = arith.constant 0 : i32
    return %arg0, %c0_i32 : i32, i32
  }
  func.func @transform_1(%arg0: i32) -> (i32, i32) {
    %c0_i32 = arith.constant 0 : i32
    %c0_i32_0 = arith.constant 0 : i32
    return %arg0, %c0_i32 : i32, i32
  }
  func.func @transform_2(%arg0: i32) -> (i32, i32) {
    %c0_i32 = arith.constant 0 : i32
    %c0_i32_0 = arith.constant 0 : i32
    %c0_i32_1 = arith.constant 0 : i32
    return %c0_i32, %c0_i32_0 : i32, i32
  }
  func.func @transform_3(%arg0: i32) -> (i32, i32) {
    %c0_i32 = arith.constant 0 : i32
    %c0_i32_0 = arith.constant 0 : i32
    %c0_i32_1 = arith.constant 0 : i32
    return %c0_i32, %c0_i32_0 : i32, i32
  }
  func.func @transform_4(%arg0: i32) -> (i32, i32) {
    %c0_i32 = arith.constant 0 : i32
    %c0_i32_0 = arith.constant 0 : i32
    %c0_i32_1 = arith.constant 0 : i32
    return %c0_i32, %c0_i32_0 : i32, i32
  }
  func.func @transform_5(%arg0: i32) -> (i32, i32) {
    %c0_i32 = arith.constant 0 : i32
    %c0_i32_0 = arith.constant 0 : i32
    %c0_i32_1 = arith.constant 0 : i32
    return %c0_i32, %c0_i32_0 : i32, i32
  }
  func.func @transform_6(%arg0: i32) -> (i32, i32) {
    %c0_i32 = arith.constant 0 : i32
    %c0_i32_0 = arith.constant 0 : i32
    %c0_i32_1 = arith.constant 0 : i32
    return %c0_i32, %c0_i32_0 : i32, i32
  }
  func.func @transform_7(%arg0: i32) -> (i32, i32) {
    %c0_i32 = arith.constant 0 : i32
    %c0_i32_0 = arith.constant 0 : i32
    return %arg0, %c0_i32 : i32, i32
  }
}

</mosaic_0001>

<bundles_post_ra>
// kernel: tpu_custom_call.1
= control target key start
LH: loop header
LB: loop body
LE: loop exit
PB: predicated region body
PF: predicated region fallthrough
CT: control target
= control target key end

     0   :  { %vm35_vm0 = vcmask 1040384   ;;  %vm113_vm1 = vcmask 1042432   ;;  %v236_v0 = vmov 0.0   ;;  %vm31_vm2 = vcmask 7168   ;;  %s304_s3 = inlined_call_operand.vmem [shape: f32[1,128], index: 3, kind: input, shape index: {}]   ;;  %s305_s2 = inlined_call_operand.vmem [shape: f32[3,128], index: 2, kind: input, shape index: {}]   ;;  %s306_s1 = inlined_call_operand.vmem [shape: f32[8,1], index: 1, kind: input, shape index: {}]   ;;  %s307_s0 = inlined_call_operand.vmem [shape: f32[8,3], index: 0, kind: input, shape index: {}]   ;;  %s308_s4 = inlined_call_operand.vmem [shape: f32[1,128], index: 4, kind: input, shape index: {}]   ;;  %s309_s5 = inlined_call_operand.vmem [shape: f32[1,128], index: 5, kind: input, shape index: {}]   ;;  %s310_s6 = inlined_call_operand.<no memory space> [shape: f32[1,1], index: 6, kind: input, shape index: {}]   ;;  %s311_s7 = inlined_call_operand.vmem [shape: f32[8,1], index: 7, kind: output, shape index: {}]  }
   0x1   :  { %224 = vmatprep.subr.mxu0 %v236_v0  ;;  %229 = vmatprep.subr.mxu1 %v236_v0  ;;  %v30_v1 = vld [vmem:[%s304_s3] sm:$0x1]  ;;  %vm237_vm3 = vmmov 0   ;;  %vm109_vm4 = vcmask 23552   ;;  %v207_v15 = vstv %s310_s6 }
   0x2   :  { %v28_v2 = vld [vmem:[%s305_s2] sm:$0x7]  ;;  %225 = vmatpush3.msk.msra.mxu0 %vm35_vm0, %v30_v1  ;;  %226 = vmatprep.mubr.msk.f32.mxu0 %vm237_vm3, %v236_v0 }
   0x3   :  { %v29_v3 = vld [vmem:[%s306_s1] sm:$0xff]  ;;  %230 = vmatpush3.msk.msra.mxu1 %vm113_vm1, %v28_v2  ;;  %231 = vmatprep.mubr.msk.f32.mxu1 %vm237_vm3, %v236_v0 }
   0x4   :  { %v27_v4 = vld [vmem:[%s307_s0] sm:$0xff]  ;;  %227 = vmatmul.mubr.msk.f32.vlgmr.msra.gmra.mrb[0].mxu0 %vm31_vm2, %v29_v3 }
   0x5   :  { %232 = vmatmul.mubr.msk.f32.vlgmr.msra.gmra.mrb[0].mxu1 %vm109_vm4, %v27_v4  ;;  %v218_v7 = vld [vmem:[%s308_s4] ss:$0 sm:$0xff] }
   0x6   :  { %v219_v12 = vld [vmem:[%s309_s5] ss:$0 sm:$0xff] }
  0xd7   :  { %v105_v5 = vpop.f32.mrb[0].mxu0 }
  0xd8   :  { %v183_v6 = vpop.f32.mrb[0].mxu1  ;;  %v228_v9 = vpop.f32.mrb[1].mxu0 }
  0xd9   :  { %v184_v8 = vadd.f32 %v183_v6, %v105_v5  ;;  %v233_v10 = vpop.f32.mrb[1].mxu1 }
  0xdb   :  { %v194_v11 = vadd.f32 %v218_v7, %v184_v8 }
  0xdd   :  { %v195_v13 = vmax.f32 %v194_v11, 0.0 }
  0xdf   :  { %v203_v14 = vmul.f32 %v219_v12, %v195_v13 }
  0xe1   :  { %204 = vadd.xlane.f32.xlu0 %v203_v14 }
 0x16e   :  { %v205_v16 = vpop.xlane.xlu0 %204 }
 0x16f   :  { %v208_v17 = vadd.f32 %v207_v15, %v205_v16 }
 0x171   :  { %209 = vst.msk [vmem:[%s311_s7] sm:$0xff] %vm31_vm2, %v208_v17 }

</bundles_post_ra>
